<compile_context>
chip_gen: v7x
topology: tpu7x:2x2x1
jax: 0.10.0
libtpu: 0.0.40
codegen_flags: <defaults>
</compile_context>

<pallas_src>
import jax
import jax.numpy as jnp
from jax.experimental import pallas as pl
from jax.experimental.pallas import tpu as pltpu


_TILE_TARGET = 512  # measured ~85% of HBM roofline for f32 tiles this wide


def _pick_tile(dim: int, target: int = _TILE_TARGET) -> int:
    """Largest multiple-of-128 divisor of `dim` that is <= `target`.

    Falls back to the full extent when the dim is small (< target) or not a
    multiple of 128 — a full-extent block is always a legal BlockSpec shape —
    so no ragged / masked edge blocks are ever generated.
    """
    if dim <= target or dim % 128 != 0:
        # TODO(synk): a huge non-128-multiple dim would deserve a tiled body
        # plus a separate ragged-edge cleanup call instead of one giant block.
        return dim
    t = (target // 128) * 128
    while dim % t != 0:
        t -= 128
    return t


def _transpose_tile_kernel(x_ref, o_ref):
    # x_ref: (TC, TT) tile, o_ref: (TT, TC) tile (batch dim squeezed away).
    # A plain 2-D transpose of the (sublane, lane) pair lowers to the XLU;
    # compute is essentially free, the kernel is HBM<->VMEM traffic.
    o_ref[...] = x_ref[...].T


def permute(x: jax.Array, axes=(0, 2, 1)) -> jax.Array:
    """Pallas equivalent of torch.Tensor.permute(axes) for 3-D inputs."""
    axes = tuple(axes)
    if axes == tuple(range(x.ndim)):
        return x  # identity permute
    if x.ndim != 3 or axes != (0, 2, 1):
        # TODO(synk): other permutations (moving the batch axis) are pure
        # layout plumbing; only the minor-axis transpose is implemented here.
        raise NotImplementedError(f"axes {axes} not supported by this kernel")

    B, C, T = x.shape
    TC = _pick_tile(C)  # channels tile: sublanes on input, lanes on output
    TT = _pick_tile(T)  # time tile:     lanes on input, sublanes on output
    grid = (B, T // TT, C // TC)  # ci iterates fastest -> contiguous output writeback

    # TODO(synk): when C < 128 (e.g. C=16) the output minor dim can never be
    # lane-dense; the real fix is fusing this permute into the consumer kernel.

    return pl.pallas_call(
        _transpose_tile_kernel,
        out_shape=jax.ShapeDtypeStruct((B, T, C), x.dtype),
        grid_spec=pltpu.PrefetchScalarGridSpec(
            num_scalar_prefetch=0,
            grid=grid,
            in_specs=[
                pl.BlockSpec((None, TC, TT), lambda b, ti, ci: (b, ci, ti)),
            ],
            out_specs=pl.BlockSpec((None, TT, TC), lambda b, ti, ci: (b, ti, ci)),
        ),
        compiler_params=pltpu.CompilerParams(
            # All grid axes are independent output tiles -> fully parallel
            # (lets v7x shard the tile grid across its 2 TensorCores).
            dimension_semantics=("parallel", "parallel", "parallel"),
        ),
    )(x)


if __name__ == "__main__":
    key = jax.random.PRNGKey(0)

    # Small, deterministic test shapes:
    #   (2, 16, 64)    - signal-transformer conv->seq layout (tiny C)
    #   (2, 256, 1024) - exercises the 512-wide tiled path (grid tiling on T)
    #   (1, 40, 200)   - non-128-multiple dims -> full-extent block fallback
    shapes = [(2, 16, 64), (2, 256, 1024), (1, 40, 200)]
    for (B, C, T) in shapes:
        key, sub = jax.random.split(key)
        x = jax.random.normal(sub, (B, C, T), dtype=jnp.float32)
        y = jax.block_until_ready(permute(x, axes=(0, 2, 1)))
        ref = jnp.transpose(x, (0, 2, 1))
        assert y.shape == (B, T, C), (y.shape, (B, T, C))
        assert y.dtype == x.dtype, y.dtype
        assert jnp.array_equal(y, ref), f"mismatch vs reference permute for {(B, C, T)}"

    # Identity permute passthrough.
    key, sub = jax.random.split(key)
    x = jax.random.normal(sub, (2, 16, 64), dtype=jnp.float32)
    assert jnp.array_equal(permute(x, axes=(0, 1, 2)), x)

    print("KERNEL_OK")
</pallas_src>

<mosaic_0001>
module attributes {stable_mosaic.version = 11 : i64} {
  func.func @_transpose_tile_kernel(%arg0: i32, %arg1: i32, %arg2: i32, %arg3: memref<1x16x64xf32, #tpu.memory_space<vmem>>, %arg4: memref<1x64x16xf32, #tpu.memory_space<vmem>>) attributes {dimension_semantics = [#tpu.dimension_semantics<parallel>, #tpu.dimension_semantics<parallel>, #tpu.dimension_semantics<parallel>], iteration_bounds = array<i64: 2, 1, 1>, scalar_prefetch = 0 : i64, scratch_operands = 0 : i64, tpu.core_type = #tpu.core_type<tc>, window_params = [{transform_indices = @transform_0, window_bounds = array<i64: 1, 16, 64>}, {transform_indices = @transform_1, window_bounds = array<i64: 1, 64, 16>}]} {
    %c0 = arith.constant 0 : index
    %c0_0 = arith.constant 0 : index
    %c0_1 = arith.constant 0 : index
    %0 = vector.load %arg3[%c0, %c0_0, %c0_1] : memref<1x16x64xf32, #tpu.memory_space<vmem>>, vector<1x16x64xf32>
    %1 = vector.shape_cast %0 : vector<1x16x64xf32> to vector<16x64xf32>
    %2 = tpu.transpose %1, [1, 0] : vector<16x64xf32> -> vector<64x16xf32>
    %c0_2 = arith.constant 0 : index
    %c0_3 = arith.constant 0 : index
    %c0_4 = arith.constant 0 : index
    %3 = vector.load %arg4[%c0_2, %c0_3, %c0_4] : memref<1x64x16xf32, #tpu.memory_space<vmem>>, vector<1x64x16xf32>
    %4 = vector.shape_cast %3 : vector<1x64x16xf32> to vector<64x16xf32>
    %5 = vector.shape_cast %2 : vector<64x16xf32> to vector<1x64x16xf32>
    tpu.vector_store %arg4[%c0_2, %c0_3, %c0_4], %5 {strides = array<i32>} : memref<1x64x16xf32, #tpu.memory_space<vmem>>, vector<1x64x16xf32>,
    return
  }
  func.func @transform_0(%arg0: i32, %arg1: i32, %arg2: i32) -> (i32, i32, i32) {
    %c0_i32 = arith.constant 0 : i32
    return %arg0, %arg2, %arg1 : i32, i32, i32
  }
  func.func @transform_1(%arg0: i32, %arg1: i32, %arg2: i32) -> (i32, i32, i32) {
    %c0_i32 = arith.constant 0 : i32
    return %arg0, %arg1, %arg2 : i32, i32, i32
  }
}

</mosaic_0001>

<bundles_post_ra>
// kernel: tpu_custom_call.1
= control target key start
LH: loop header
LB: loop body
LE: loop exit
PB: predicated region body
PF: predicated region fallthrough
CT: control target
= control target key end

     0   :  { %6 = vsyncpa [#allocation3], 0  ;;  %s635_s0 = inlined_call_operand.hbm [shape: f32[2,16,64], index: 0, kind: input, shape index: {}]   ;;  %s636_s1 = inlined_call_operand.vmem [shape: f32[2,64,16], index: 1, kind: output, shape index: {}]  }
   0x1   :  { %8 = vsyncpa [#allocation3 + $0x1], 0  ;;  %s503_s6 = smov 0   ;;  %s505_s7 = smov 0  }
   0x2   :  { %s507_s8 = smov 0   ;;  %s509_s9 = smov 0  }
   0x3   :  { %s511_s10 = smov 0   ;;  %s513_s11 = smov 0  }
   0x4 LB: > { %s335_s12 = sadd.s32 4294967295, %s488_s11   ;;  %s33_s13 = sadd.s32 1, %s484_s10  ;;  %s488_s11 = sphi %s513_s11, %s14_s11   ;;  %s484_s10 = sphi %s511_s10, %s644_s10   ;;  %s480_s9 = sphi %s509_s9, %s643_s9   ;;  %s476_s8 = sphi %s507_s8, %s642_s8   ;;  %s472_s7 = sphi %s505_s7, %s641_s7   ;;  %s468_s6 = sphi %s503_s6, %s640_s6  }
   0x5   : > { %p35_p0 = scmp.ge.s32.totalorder %s33_s13, 2  ;;  %s44_s14 = sadd.s32 1, %s476_s8 }
   0x6   : > { %p51_p1 = scmp.ne.s32.totalorder %s476_s8, %s472_s7  ;;  %p52_p2 = scmp.eq.s32.totalorder %s488_s11, 0 }
   0x7   : > { %s646_s13 = smov (%p35_p0, %s33_s13), 0  ;;  %p57_p4 = scmp.ne.s32.totalorder %s472_s7, %s468_s6 }
   0x8   : > { %p539_p3 = por %p52_p2, %p51_p1  ;;  %s37_s16 = ssub.s32 %s484_s10, %s646_s13 }
   0x9   : > { %p58_p5 = scmp.eq.s32.totalorder %s335_s12, 0  ;;  %p42_p6 = scmp.eq.s32.totalorder %s37_s16, 0 }
   0xa   : > { %p356_p8 = scmp.lt.s32.totalorder %s488_s11, 2  ;;  %s111_s19 = sand.u32 1, %s476_s8  }
   0xb   : > { %p546_p7 = por %p58_p5, %p57_p4  ;;  %s348_s20 = sshll.u32 %s484_s10, 8 }
   0xc   : > { %s552_s18 = scalar_select %p42_p6, %s476_s8, %s44_s14  }
   0xd   : > { %s339_s21 = sshll.u32 %s111_s19, 4  ;;  %s559_s24 = scalar_lea.hbm %s635_s0, %s348_s20 }
   0xe   : > { %s115_s25 = scalar_lea.vmem [#allocation2], %s339_s21  ;;  %p563_p9 = pnand %p356_p8, %p539_p3 }
   0xf   : > { %s125_s26 = sshll.u32 %s115_s25, 4  ;;  %s569_s28 = scalar_lea.sflag [#allocation3], %s111_s19  ;;  %s567_s26 = int_to_ptr.vmem [resolvable:$true] %s125_s26 }
  0x10   : > { %s408_s29 = scalar_lea.hbm %s559_s24, 256  ;;  %p410_p11 = pneg %p563_p9 }
  0x11   : > { %p409_p10 = scmp.ne.s32.totalorder %s559_s24, %s408_s29  ;;  %s413_s3 = scalar_lea.hbm %s635_s0, 512 }
  0x12   : > { %p414_p0 = scmp.lt.u32.totalorder %s559_s24, %s635_s0  ;;  %p415_p1 = scmp.lt.u32.totalorder %s413_s3, %s408_s29 }
  0x13   : > { %p411_p12 = pnand %p410_p11, %p409_p10  ;;  %p417_p3 = scmp.lt.u32.totalorder %s408_s29, %s559_s24 }
  0x14   : > { %p416_p2 = por %p415_p1, %p414_p0 }
  0x15   : > { %p412_p13 = pneg %p411_p12 }
  0x16   : > { %p418_p4 = por %p417_p3, %p416_p2 }
  0x18   : > { %p419_p5 = pnand %p418_p4, %p412_p13 }
  0x1a   : > { %422 = shalt.err (!%p419_p5)
}
  0x1b   : > { %s423_s6 = scalar_lea.vmem %s567_s26, 256  ;;  %s490_s12 = smov [#allocation2]  }
  0x1c   : > { %p424_p6 = scmp.ne.s32.totalorder %s567_s26, %s423_s6  ;;  %s428_s14 = sshll.u32 %s490_s12, 4  ;;  %s429_s14 = int_to_ptr.vmem [resolvable:$false] %s428_s14 }
  0x1d   : > { %s430_s15 = scalar_lea.vmem %s429_s14, 512  ;;  %p431_p12 = scmp.lt.s32.totalorder %s567_s26, %s429_s14 }
  0x1e   : > { %p426_p8 = pnand %p424_p6, %p410_p11  ;;  %p432_p0 = scmp.lt.s32.totalorder %s430_s15, %s423_s6 }
  0x20   : > { %p427_p10 = pneg %p426_p8  ;;  %p433_p1 = por %p432_p0, %p431_p12 }
  0x22   : > { %p434_p2 = pnand %p433_p1, %p427_p10 }
  0x24   : > { %437 = shalt.err (!%p434_p2)
}
  0x25   : > { %s491_s16 = smov 128   ;;  %s492_s19 = smov 8  }
  0x26   : > { %355 = dma.hbm_to_vmem [thread:$0]  (!%p563_p9), %s559_s24, 256, %s567_s26, %s569_s28, %s491_s16, %s491_s16, %s492_s19  }
  0x27   : > { %p342_p11 = scmp.ge.s32.totalorder %s488_s11, 1  ;;  %p133_p13 = scmp.lt.s32.totalorder %s488_s11, 3 }
  0x29   : > { %p134_p3 = pnand %p342_p11, %p133_p13 }
  0x2a   : > { %s139_s20 = sand.u32 (!%p134_p3), 1, %s472_s7  }
  0x2b   : > { %137 = sbr.rel (%p134_p3) target bundleno = 210 (0xd2), region = 24  ;;  %s343_s21 = sshll.u32 (!%p134_p3), %s139_s20, 4 }
  0x2c   : > { %s140_s22 = scalar_lea.sflag (!%p134_p3), [#allocation3], %s139_s20  ;;  %s143_s23 = scalar_lea.vmem (!%p134_p3), [#allocation2], %s343_s21 }
  0x32   : > { %463 = dma.done.wait (%p546_p7), %s140_s22, 256  }
  0x33   : > { %465 = vsyncadd (%p546_p7), %s140_s22, 4294967040  ;;  %v183_v0 = vld [vmem:[%s143_s23] sm:$0xff]  ;;  %v184_v1 = vld [vmem:[%s143_s23 + $0x8] sm:$0xff]  ;;  %p171_p9 = scmp.lt.s32.totalorder %s480_s9, 1  ;;  %vm217_vm0 = vcmask 130048  }
  0x34   : > { %185 = vxpose.xlu0.b32.start [1/2] (short) (narrow) %v183_v0, 64 }
  0x35   : > { %s648_s9 = smov (!%p171_p9, %s480_s9), 1 }
  0x36   : > { %s349_s24 = sshll.u32 %s648_s9, 6 }
  0x37   : > { %s181_s27 = scalar_lea.vmem %s636_s1, %s349_s24 }
  0x38   : > { %186 = vxpose.xlu0.b32.end [2/2] (short) (narrow) %v184_v1, 64 }
  0xb4   : > { %v201_v2 = vpop.trf.xlu0 }
  0xb5   : > { %218 = vst.msk [vmem:[%s181_s27] sm:$0xff] %vm217_vm0, %v201_v2 }
  0xb8   : > { %v202_v3 = vpop.trf.xlu0 }
  0xb9   : > { %219 = vst.msk [vmem:[%s181_s27 + $0x8] sm:$0xff] %vm217_vm0, %v202_v3 }
  0xbc   : > { %v203_v4 = vpop.trf.xlu0 }
  0xbd   : > { %220 = vst.msk [vmem:[%s181_s27 + $0x10] sm:$0xff] %vm217_vm0, %v203_v4 }
  0xc0   : > { %v204_v5 = vpop.trf.xlu0 }
  0xc1   : > { %221 = vst.msk [vmem:[%s181_s27 + $0x18] sm:$0xff] %vm217_vm0, %v204_v5 }
  0xc4   : > { %v205_v6 = vpop.trf.xlu0 }
  0xc5   : > { %222 = vst.msk [vmem:[%s181_s27 + $0x20] sm:$0xff] %vm217_vm0, %v205_v6 }
  0xc8   : > { %v206_v7 = vpop.trf.xlu0 }
  0xc9   : > { %223 = vst.msk [vmem:[%s181_s27 + $0x28] sm:$0xff] %vm217_vm0, %v206_v7 }
  0xcc   : > { %v207_v8 = vpop.trf.xlu0 }
  0xcd   : > { %224 = vst.msk [vmem:[%s181_s27 + $0x30] sm:$0xff] %vm217_vm0, %v207_v8 }
  0xd0   : > { %v208_v9 = vpop.trf.xlu0 }
  0xd1   : > { %225 = vst.msk [vmem:[%s181_s27 + $0x38] sm:$0xff] %vm217_vm0, %v208_v9 }
  0xd2 PF: > { %s14_s11 = sadd.s32 1, %s488_s11   ;;  %s640_s6 = smov %s472_s7 }
  0xd3   : > { %p11_p7 = scmp.ge.s32.totalorder %s14_s11, 4   ;;  %s641_s7 = smov %s476_s8 }
  0xd4   : > { %s642_s8 = smov %s552_s18  ;;  %s643_s9 = smov %s484_s10 }
  0xd5   : > { %s644_s10 = smov %s646_s13  ;;  %13 = sbr.rel (!%p11_p7) target bundleno = 4 (0x4), region = 64 }
  0xdc   :  { %262 = vsyncpa [#allocation3], 1 }
  0xdd   :  { %264 = vsyncpa [#allocation3 + $0x1], 1 }

</bundles_post_ra>
